<compile_context>
chip_gen: v6e
topology: v6e:2x2x1
jax: 0.10.0
libtpu: 0.0.40
codegen_flags: <defaults>
</compile_context>

<pallas_src>
import math

import jax
import jax.numpy as jnp
from jax.experimental import pallas as pl
from jax.experimental.pallas import tpu as pltpu

_VMEM_LIMIT_BYTES = 48 * 1024 * 1024  # above 32 MiB default, below v7x physical


def _pick_tile(s, candidates=(512, 256, 128)):
    """Largest preferred tile that divides s; fall back to full extent."""
    for t in candidates:
        if s >= t and s % t == 0:
            return t
    return s


# --------------------------------------------------------------------------- #
# Stage 1: head-major QKV projection.
#   grid = (B, S//tq, H)
#   x      : (B, S, D)        block (1, tq, D)
#   wq/k/v : (H, D, dh)       block (1, D, dh)   (wq, bq pre-scaled by 1/sqrt(dh))
#   bq/k/v : (H, 1, dh)       block (1, 1, dh)
#   q/k/v  : (B*H, S, dh)     block (1, tq, dh)
# --------------------------------------------------------------------------- #
def _qkv_proj_kernel(x_ref, wq_ref, wk_ref, wv_ref, bq_ref, bk_ref, bv_ref,
                     q_ref, k_ref, v_ref):
    x = x_ref[0]                                               # (tq, D)

    def proj(w_ref, b_ref, o_ref):
        y = jnp.dot(x, w_ref[0], preferred_element_type=jnp.float32)
        y = y + b_ref[0].astype(jnp.float32)                   # (1, dh) broadcast
        o_ref[0] = y.astype(o_ref.dtype)

    proj(wq_ref, bq_ref, q_ref)
    proj(wk_ref, bk_ref, k_ref)
    proj(wv_ref, bv_ref, v_ref)


# --------------------------------------------------------------------------- #
# Stage 2: flash attention + fused out_proj.
#   grid = (B, S//tq, H, S//tk)   semantics (parallel, parallel, arbitrary, arbitrary)
#   q/k/v : (B*H, S, dh)   blocks (1, tq|tk, dh)
#   wo    : (H, dh, D)     block (1, dh, D)
#   bo    : (1, D)
#   o     : (B, S, D)      block (1, tq, D)  — resident across (h, kv), written once
# --------------------------------------------------------------------------- #
def _flash_attn_kernel(q_ref, k_ref, v_ref, wo_ref, bo_ref, o_ref,
                       m_ref, l_ref, acc_ref, oacc_ref):
    h = pl.program_id(2)
    ki = pl.program_id(3)
    last_h = pl.num_programs(2) - 1
    last_k = pl.num_programs(3) - 1

    @pl.when(jnp.logical_and(h == 0, ki == 0))
    def _():
        oacc_ref[...] = jnp.zeros_like(oacc_ref)

    @pl.when(ki == 0)
    def _():
        m_ref[...] = jnp.full_like(m_ref, -jnp.inf)
        l_ref[...] = jnp.zeros_like(l_ref)
        acc_ref[...] = jnp.zeros_like(acc_ref)

    q = q_ref[0]                                               # (tq, dh), pre-scaled
    k = k_ref[0]                                               # (tk, dh)
    v = v_ref[0]                                               # (tk, dh)

    # s = q @ k^T without an explicit transpose (contract on last dims).
    s = jax.lax.dot_general(q, k, (((1,), (1,)), ((), ())),
                            preferred_element_type=jnp.float32)  # (tq, tk) f32

    m_prev = m_ref[...]
    m_new = jnp.maximum(m_prev, jnp.max(s, axis=-1, keepdims=True))
    alpha = jnp.exp(m_prev - m_new)
    p = jnp.exp(s - m_new)
    l_ref[...] = alpha * l_ref[...] + jnp.sum(p, axis=-1, keepdims=True)
    acc_ref[...] = alpha * acc_ref[...] + jnp.dot(
        p.astype(v.dtype), v, preferred_element_type=jnp.float32)
    m_ref[...] = m_new

    @pl.when(ki == last_k)
    def _():
        # Finish this head's tile and fold it through out_proj's head slice.
        attn_h = acc_ref[...] * pl.reciprocal(l_ref[...], approx=True)  # (tq, dh)
        oacc_ref[...] += jnp.dot(attn_h.astype(wo_ref.dtype), wo_ref[0],
                                 preferred_element_type=jnp.float32)

    @pl.when(jnp.logical_and(h == last_h, ki == last_k))
    def _():
        o_ref[0] = (oacc_ref[...] + bo_ref[...]).astype(o_ref.dtype)


def self_attention_pallas(x, w_in, b_in, w_out, b_out, n_heads,
                          *, compute_dtype=None):
    """x: (B, S, D); w_in: (D, 3D); b_in: (1, 3D); w_out: (D, D); b_out: (1, D).

    compute_dtype: dtype used for MXU inputs (e.g. jnp.bfloat16); accumulation
    and softmax math are always f32.  Output dtype matches x.dtype.
    """
    B, S, D = x.shape
    assert D % n_heads == 0, "d_embed must be divisible by n_heads"
    H = n_heads
    dh = D // H
    cdt = jnp.dtype(compute_dtype) if compute_dtype is not None else x.dtype
    scale = 1.0 / math.sqrt(dh)

    # ---- head-major parameter re-layout (tiny, one-time, outside kernels) ----
    w_q, w_k, w_v = jnp.split(w_in, 3, axis=-1)                # (D, D) each

    def head_major(w):                                         # (D, D) -> (H, D, dh)
        return w.reshape(D, H, dh).transpose(1, 0, 2)

    wq = (head_major(w_q) * scale).astype(cdt)                 # fold 1/sqrt(dh) into q
    wk = head_major(w_k).astype(cdt)
    wv = head_major(w_v).astype(cdt)
    b_q, b_k, b_v = jnp.split(b_in.reshape(3 * D), 3)          # (D,) each
    bq = (b_q.reshape(H, 1, dh) * scale).astype(cdt)
    bk = b_k.reshape(H, 1, dh).astype(cdt)
    bv = b_v.reshape(H, 1, dh).astype(cdt)
    wo = w_out.reshape(H, dh, D).astype(cdt)                   # (H, dh, D)
    bo = b_out.reshape(1, D).astype(jnp.float32)
    xc = x.astype(cdt)

    tq = _pick_tile(S)
    tk = _pick_tile(S)
    n_q = S // tq
    n_kv = S // tk

    # ---------------- stage 1: QKV projection (head-major) ----------------
    q, k, v = pl.pallas_call(
        _qkv_proj_kernel,
        out_shape=[jax.ShapeDtypeStruct((B * H, S, dh), cdt)] * 3,
        grid_spec=pltpu.PrefetchScalarGridSpec(
            num_scalar_prefetch=0,
            grid=(B, n_q, H),
            in_specs=[
                pl.BlockSpec((1, tq, D), lambda b, i, h: (b, i, 0)),
                pl.BlockSpec((1, D, dh), lambda b, i, h: (h, 0, 0)),
                pl.BlockSpec((1, D, dh), lambda b, i, h: (h, 0, 0)),
                pl.BlockSpec((1, D, dh), lambda b, i, h: (h, 0, 0)),
                pl.BlockSpec((1, 1, dh), lambda b, i, h: (h, 0, 0)),
                pl.BlockSpec((1, 1, dh), lambda b, i, h: (h, 0, 0)),
                pl.BlockSpec((1, 1, dh), lambda b, i, h: (h, 0, 0)),
            ],
            out_specs=[
                pl.BlockSpec((1, tq, dh), lambda b, i, h: (b * H + h, i, 0)),
                pl.BlockSpec((1, tq, dh), lambda b, i, h: (b * H + h, i, 0)),
                pl.BlockSpec((1, tq, dh), lambda b, i, h: (b * H + h, i, 0)),
            ],
        ),
        compiler_params=pltpu.CompilerParams(
            dimension_semantics=("parallel", "parallel", "parallel"),
            vmem_limit_bytes=_VMEM_LIMIT_BYTES),
    )(xc, wq, wk, wv, bq, bk, bv)

    # ------------- stage 2: flash attention + fused out_proj --------------
    out = pl.pallas_call(
        _flash_attn_kernel,
        out_shape=jax.ShapeDtypeStruct((B, S, D), x.dtype),
        grid_spec=pltpu.PrefetchScalarGridSpec(
            num_scalar_prefetch=0,
            grid=(B, n_q, H, n_kv),
            in_specs=[
                pl.BlockSpec((1, tq, dh), lambda b, qi, h, ki: (b * H + h, qi, 0)),
                pl.BlockSpec((1, tk, dh), lambda b, qi, h, ki: (b * H + h, ki, 0)),
                pl.BlockSpec((1, tk, dh), lambda b, qi, h, ki: (b * H + h, ki, 0)),
                pl.BlockSpec((1, dh, D), lambda b, qi, h, ki: (h, 0, 0)),
                pl.BlockSpec((1, D), lambda b, qi, h, ki: (0, 0)),
            ],
            out_specs=pl.BlockSpec((1, tq, D), lambda b, qi, h, ki: (b, qi, 0)),
            scratch_shapes=[
                pltpu.VMEM((tq, 1), jnp.float32),    # m (running max)
                pltpu.VMEM((tq, 1), jnp.float32),    # l (running denom)
                pltpu.VMEM((tq, dh), jnp.float32),   # per-head acc
                pltpu.VMEM((tq, D), jnp.float32),    # out_proj accumulator
            ],
        ),
        compiler_params=pltpu.CompilerParams(
            dimension_semantics=("parallel", "parallel", "arbitrary", "arbitrary"),
            vmem_limit_bytes=_VMEM_LIMIT_BYTES),
    )(q, k, v, wo, bo)

    return out


def self_attention_ref(x, w_in, b_in, w_out, b_out, n_heads):
    """Pure-JAX reference (intended semantics of the PyTorch module)."""
    B, S, D = x.shape
    d_head = D // n_heads
    qkv = jnp.einsum("bsd,de->bse", x, w_in) + b_in[0]
    q, k, v = jnp.split(qkv, 3, axis=-1)

    def heads(t):
        return t.reshape(B, S, n_heads, d_head).transpose(0, 2, 1, 3)

    q, k, v = heads(q), heads(k), heads(v)
    s = jnp.einsum("bhqd,bhkd->bhqk", q, k) / math.sqrt(d_head)
    p = jax.nn.softmax(s, axis=-1)
    o = jnp.einsum("bhqk,bhkd->bhqd", p, v)
    o = o.transpose(0, 2, 1, 3).reshape(B, S, D)
    return jnp.einsum("bsd,de->bse", o, w_out) + b_out[0]


if __name__ == "__main__":
    # Small shapes consistent with the module's forward: (batch, seq, d_embed)
    B, S, D = 2, 8, 32
    n_heads = 4

    key = jax.random.PRNGKey(0)
    kx, kwi, kbi, kwo, kbo = jax.random.split(key, 5)

    x = jax.random.normal(kx, (B, S, D), dtype=jnp.float32)
    # PyTorch Linear stores (out,in); we store already-transposed (in,out).
    w_in = jax.random.normal(kwi, (D, 3 * D), dtype=jnp.float32) * 0.05
    b_in = jax.random.normal(kbi, (1, 3 * D), dtype=jnp.float32) * 0.05
    w_out = jax.random.normal(kwo, (D, D), dtype=jnp.float32) * 0.05
    b_out = jax.random.normal(kbo, (1, D), dtype=jnp.float32) * 0.05

    ref = self_attention_ref(x, w_in, b_in, w_out, b_out, n_heads)

    # f32 compute path (approx reciprocal is the only approximation).
    out_f32 = jax.block_until_ready(
        self_attention_pallas(x, w_in, b_in, w_out, b_out, n_heads,
                              compute_dtype=jnp.float32))
    assert out_f32.shape == (B, S, D)
    assert jnp.allclose(out_f32, ref, atol=5e-3, rtol=5e-3), "f32 mismatch vs reference"

    # bf16 MXU path with f32 accumulation (recommended production config).
    out_bf16 = jax.block_until_ready(
        self_attention_pallas(x, w_in, b_in, w_out, b_out, n_heads,
                              compute_dtype=jnp.bfloat16))
    assert out_bf16.shape == (B, S, D)
    assert jnp.allclose(out_bf16.astype(jnp.float32), ref,
                        atol=3e-2, rtol=3e-2), "bf16 mismatch vs reference"

    print("KERNEL_OK")
</pallas_src>

<mosaic_0001>
module attributes {stable_mosaic.version = 11 : i64} {
  func.func @_qkv_proj_kernel(%arg0: i32, %arg1: i32, %arg2: i32, %arg3: memref<1x8x32xf32, #tpu.memory_space<vmem>>, %arg4: memref<1x32x8xf32, #tpu.memory_space<vmem>>, %arg5: memref<1x32x8xf32, #tpu.memory_space<vmem>>, %arg6: memref<1x32x8xf32, #tpu.memory_space<vmem>>, %arg7: memref<1x1x8xf32, #tpu.memory_space<vmem>>, %arg8: memref<1x1x8xf32, #tpu.memory_space<vmem>>, %arg9: memref<1x1x8xf32, #tpu.memory_space<vmem>>, %arg10: memref<1x8x8xf32, #tpu.memory_space<vmem>>, %arg11: memref<1x8x8xf32, #tpu.memory_space<vmem>>, %arg12: memref<1x8x8xf32, #tpu.memory_space<vmem>>) attributes {dimension_semantics = [#tpu.dimension_semantics<parallel>, #tpu.dimension_semantics<parallel>, #tpu.dimension_semantics<parallel>], iteration_bounds = array<i64: 2, 1, 4>, scalar_prefetch = 0 : i64, scratch_operands = 0 : i64, tpu.core_type = #tpu.core_type<tc>, window_params = [{transform_indices = @transform_0, window_bounds = array<i64: 1, 8, 32>}, {transform_indices = @transform_1, window_bounds = array<i64: 1, 32, 8>}, {transform_indices = @transform_2, window_bounds = array<i64: 1, 32, 8>}, {transform_indices = @transform_3, window_bounds = array<i64: 1, 32, 8>}, {transform_indices = @transform_4, window_bounds = array<i64: 1, 1, 8>}, {transform_indices = @transform_5, window_bounds = array<i64: 1, 1, 8>}, {transform_indices = @transform_6, window_bounds = array<i64: 1, 1, 8>}, {transform_indices = @transform_7, window_bounds = array<i64: 1, 8, 8>}, {transform_indices = @transform_8, window_bounds = array<i64: 1, 8, 8>}, {transform_indices = @transform_9, window_bounds = array<i64: 1, 8, 8>}]} {
    %c0 = arith.constant 0 : index
    %c0_0 = arith.constant 0 : index
    %c0_1 = arith.constant 0 : index
    %0 = vector.load %arg3[%c0, %c0_0, %c0_1] : memref<1x8x32xf32, #tpu.memory_space<vmem>>, vector<1x8x32xf32>
    %1 = vector.shape_cast %0 : vector<1x8x32xf32> to vector<8x32xf32>
    %c0_2 = arith.constant 0 : index
    %c0_3 = arith.constant 0 : index
    %c0_4 = arith.constant 0 : index
    %2 = vector.load %arg4[%c0_2, %c0_3, %c0_4] : memref<1x32x8xf32, #tpu.memory_space<vmem>>, vector<1x32x8xf32>
    %3 = vector.shape_cast %2 : vector<1x32x8xf32> to vector<32x8xf32>
    %cst = arith.constant dense<0.000000e+00> : vector<8x8xf32>
    %4 = tpu.matmul %1, %3, %cst {dimension_numbers = #tpu.dot_dimension_numbers<[1], [0], [0], [1], [0, 0, 1, 1], [], []>} : vector<8x32xf32>, vector<32x8xf32>, vector<8x8xf32> -> vector<8x8xf32>
    %c0_5 = arith.constant 0 : index
    %c0_6 = arith.constant 0 : index
    %c0_7 = arith.constant 0 : index
    %5 = vector.load %arg7[%c0_5, %c0_6, %c0_7] : memref<1x1x8xf32, #tpu.memory_space<vmem>>, vector<1x1x8xf32>
    %6 = vector.shape_cast %5 : vector<1x1x8xf32> to vector<1x8xf32>
    %7 = vector.broadcast %6 : vector<1x8xf32> to vector<8x8xf32>
    %8 = arith.addf %4, %7 : vector<8x8xf32>
    %c0_8 = arith.constant 0 : index
    %c0_9 = arith.constant 0 : index
    %c0_10 = arith.constant 0 : index
    %9 = vector.load %arg10[%c0_8, %c0_9, %c0_10] : memref<1x8x8xf32, #tpu.memory_space<vmem>>, vector<1x8x8xf32>
    %10 = vector.shape_cast %9 : vector<1x8x8xf32> to vector<8x8xf32>
    %11 = vector.shape_cast %8 : vector<8x8xf32> to vector<1x8x8xf32>
    tpu.vector_store %arg10[%c0_8, %c0_9, %c0_10], %11 {strides = array<i32>} : memref<1x8x8xf32, #tpu.memory_space<vmem>>, vector<1x8x8xf32>,
    %c0_11 = arith.constant 0 : index
    %c0_12 = arith.constant 0 : index
    %c0_13 = arith.constant 0 : index
    %12 = vector.load %arg5[%c0_11, %c0_12, %c0_13] : memref<1x32x8xf32, #tpu.memory_space<vmem>>, vector<1x32x8xf32>
    %13 = vector.shape_cast %12 : vector<1x32x8xf32> to vector<32x8xf32>
    %cst_14 = arith.constant dense<0.000000e+00> : vector<8x8xf32>
    %14 = tpu.matmul %1, %13, %cst_14 {dimension_numbers = #tpu.dot_dimension_numbers<[1], [0], [0], [1], [0, 0, 1, 1], [], []>} : vector<8x32xf32>, vector<32x8xf32>, vector<8x8xf32> -> vector<8x8xf32>
    %c0_15 = arith.constant 0 : index
    %c0_16 = arith.constant 0 : index
    %c0_17 = arith.constant 0 : index
    %15 = vector.load %arg8[%c0_15, %c0_16, %c0_17] : memref<1x1x8xf32, #tpu.memory_space<vmem>>, vector<1x1x8xf32>
    %16 = vector.shape_cast %15 : vector<1x1x8xf32> to vector<1x8xf32>
    %17 = vector.broadcast %16 : vector<1x8xf32> to vector<8x8xf32>
    %18 = arith.addf %14, %17 : vector<8x8xf32>
    %c0_18 = arith.constant 0 : index
    %c0_19 = arith.constant 0 : index
    %c0_20 = arith.constant 0 : index
    %19 = vector.load %arg11[%c0_18, %c0_19, %c0_20] : memref<1x8x8xf32, #tpu.memory_space<vmem>>, vector<1x8x8xf32>
    %20 = vector.shape_cast %19 : vector<1x8x8xf32> to vector<8x8xf32>
    %21 = vector.shape_cast %18 : vector<8x8xf32> to vector<1x8x8xf32>
    tpu.vector_store %arg11[%c0_18, %c0_19, %c0_20], %21 {strides = array<i32>} : memref<1x8x8xf32, #tpu.memory_space<vmem>>, vector<1x8x8xf32>,
    %c0_21 = arith.constant 0 : index
    %c0_22 = arith.constant 0 : index
    %c0_23 = arith.constant 0 : index
    %22 = vector.load %arg6[%c0_21, %c0_22, %c0_23] : memref<1x32x8xf32, #tpu.memory_space<vmem>>, vector<1x32x8xf32>
    %23 = vector.shape_cast %22 : vector<1x32x8xf32> to vector<32x8xf32>
    %cst_24 = arith.constant dense<0.000000e+00> : vector<8x8xf32>
    %24 = tpu.matmul %1, %23, %cst_24 {dimension_numbers = #tpu.dot_dimension_numbers<[1], [0], [0], [1], [0, 0, 1, 1], [], []>} : vector<8x32xf32>, vector<32x8xf32>, vector<8x8xf32> -> vector<8x8xf32>
    %c0_25 = arith.constant 0 : index
    %c0_26 = arith.constant 0 : index
    %c0_27 = arith.constant 0 : index
    %25 = vector.load %arg9[%c0_25, %c0_26, %c0_27] : memref<1x1x8xf32, #tpu.memory_space<vmem>>, vector<1x1x8xf32>
    %26 = vector.shape_cast %25 : vector<1x1x8xf32> to vector<1x8xf32>
    %27 = vector.broadcast %26 : vector<1x8xf32> to vector<8x8xf32>
    %28 = arith.addf %24, %27 : vector<8x8xf32>
    %c0_28 = arith.constant 0 : index
    %c0_29 = arith.constant 0 : index
    %c0_30 = arith.constant 0 : index
    %29 = vector.load %arg12[%c0_28, %c0_29, %c0_30] : memref<1x8x8xf32, #tpu.memory_space<vmem>>, vector<1x8x8xf32>
    %30 = vector.shape_cast %29 : vector<1x8x8xf32> to vector<8x8xf32>
    %31 = vector.shape_cast %28 : vector<8x8xf32> to vector<1x8x8xf32>
    tpu.vector_store %arg12[%c0_28, %c0_29, %c0_30], %31 {strides = array<i32>} : memref<1x8x8xf32, #tpu.memory_space<vmem>>, vector<1x8x8xf32>,
    return
  }
  func.func @transform_0(%arg0: i32, %arg1: i32, %arg2: i32) -> (i32, i32, i32) {
    %c0_i32 = arith.constant 0 : i32
    %c0_i32_0 = arith.constant 0 : i32
    return %arg0, %arg1, %c0_i32 : i32, i32, i32
  }
  func.func @transform_1(%arg0: i32, %arg1: i32, %arg2: i32) -> (i32, i32, i32) {
    %c0_i32 = arith.constant 0 : i32
    %c0_i32_0 = arith.constant 0 : i32
    %c0_i32_1 = arith.constant 0 : i32
    return %arg2, %c0_i32, %c0_i32_0 : i32, i32, i32
  }
  func.func @transform_2(%arg0: i32, %arg1: i32, %arg2: i32) -> (i32, i32, i32) {
    %c0_i32 = arith.constant 0 : i32
    %c0_i32_0 = arith.constant 0 : i32
    %c0_i32_1 = arith.constant 0 : i32
    return %arg2, %c0_i32, %c0_i32_0 : i32, i32, i32
  }
  func.func @transform_3(%arg0: i32, %arg1: i32, %arg2: i32) -> (i32, i32, i32) {
    %c0_i32 = arith.constant 0 : i32
    %c0_i32_0 = arith.constant 0 : i32
    %c0_i32_1 = arith.constant 0 : i32
    return %arg2, %c0_i32, %c0_i32_0 : i32, i32, i32
  }
  func.func @transform_4(%arg0: i32, %arg1: i32, %arg2: i32) -> (i32, i32, i32) {
    %c0_i32 = arith.constant 0 : i32
    %c0_i32_0 = arith.constant 0 : i32
    %c0_i32_1 = arith.constant 0 : i32
    return %arg2, %c0_i32, %c0_i32_0 : i32, i32, i32
  }
  func.func @transform_5(%arg0: i32, %arg1: i32, %arg2: i32) -> (i32, i32, i32) {
    %c0_i32 = arith.constant 0 : i32
    %c0_i32_0 = arith.constant 0 : i32
    %c0_i32_1 = arith.constant 0 : i32
    return %arg2, %c0_i32, %c0_i32_0 : i32, i32, i32
  }
  func.func @transform_6(%arg0: i32, %arg1: i32, %arg2: i32) -> (i32, i32, i32) {
    %c0_i32 = arith.constant 0 : i32
    %c0_i32_0 = arith.constant 0 : i32
    %c0_i32_1 = arith.constant 0 : i32
    return %arg2, %c0_i32, %c0_i32_0 : i32, i32, i32
  }
  func.func @transform_7(%arg0: i32, %arg1: i32, %arg2: i32) -> (i32, i32, i32) {
    %c4_i32 = arith.constant 4 : i32
    %0 = arith.muli %arg0, %c4_i32 : i32
    %1 = arith.addi %0, %arg2 : i32
    %c0_i32 = arith.constant 0 : i32
    %c0_i32_0 = arith.constant 0 : i32
    return %1, %arg1, %c0_i32 : i32, i32, i32
  }
  func.func @transform_8(%arg0: i32, %arg1: i32, %arg2: i32) -> (i32, i32, i32) {
    %c4_i32 = arith.constant 4 : i32
    %0 = arith.muli %arg0, %c4_i32 : i32
    %1 = arith.addi %0, %arg2 : i32
    %c0_i32 = arith.constant 0 : i32
    %c0_i32_0 = arith.constant 0 : i32
    return %1, %arg1, %c0_i32 : i32, i32, i32
  }
  func.func @transform_9(%arg0: i32, %arg1: i32, %arg2: i32) -> (i32, i32, i32) {
    %c4_i32 = arith.constant 4 : i32
    %0 = arith.muli %arg0, %c4_i32 : i32
    %1 = arith.addi %0, %arg2 : i32
    %c0_i32 = arith.constant 0 : i32
    %c0_i32_0 = arith.constant 0 : i32
    return %1, %arg1, %c0_i32 : i32, i32, i32
  }
}

</mosaic_0001>

<bundles_post_ra>
// kernel: tpu_custom_call.1
= control target key start
LH: loop header
LB: loop body
LE: loop exit
PB: predicated region body
PF: predicated region fallthrough
CT: control target
= control target key end

     0   :  { %s1651_s0 = inlined_call_operand.vmem [shape: f32[2,8,32], index: 0, kind: input, shape index: {}]   ;;  %s1652_s1 = inlined_call_operand.vmem [shape: f32[4,32,8], index: 1, kind: input, shape index: {}]   ;;  %s1653_s2 = inlined_call_operand.vmem [shape: f32[4,32,8], index: 2, kind: input, shape index: {}]   ;;  %s1654_s3 = inlined_call_operand.vmem [shape: f32[4,32,8], index: 3, kind: input, shape index: {}]   ;;  %s1655_s4 = inlined_call_operand.vmem [shape: f32[4,1,8], index: 4, kind: input, shape index: {}]   ;;  %s1656_s5 = inlined_call_operand.vmem [shape: f32[4,1,8], index: 5, kind: input, shape index: {}]   ;;  %s1657_s6 = inlined_call_operand.vmem [shape: f32[4,1,8], index: 6, kind: input, shape index: {}]   ;;  %s1658_s7 = inlined_call_operand.hbm [shape: f32[8,8,8], index: 7, kind: output, shape index: {0}]   ;;  %s1659_s8 = inlined_call_operand.hbm [shape: f32[8,8,8], index: 8, kind: output, shape index: {1}]   ;;  %s1660_s9 = inlined_call_operand.hbm [shape: f32[8,8,8], index: 9, kind: output, shape index: {2}]  }
   0x1   :  { %1668 = sst [smem:[#allocation14_spill]] %s1651_s0 }
   0x2   :  { %1669 = sst [smem:[#allocation15_spill]] %s1652_s1 }
   0x3   :  { %1670 = sst [smem:[#allocation16_spill]] %s1653_s2 }
   0x4   :  { %15 = vsyncpa [#allocation3], 0 }
   0x5   :  { %17 = vsyncpa [#allocation3 + $0x1], 0 }
   0x6   :  { %18 = vsyncpa [#allocation5], 0 }
   0x7   :  { %20 = vsyncpa [#allocation5 + $0x1], 0  ;;  %s1399_s30 = smov 0   ;;  %s1401_s10 = smov 0  }
   0x8   :  { %s1403_s11 = smov 0   ;;  %s1405_s12 = smov 0  }
   0x9   :  { %s1407_s13 = smov 0   ;;  %s1409_s14 = smov 0  }
   0xa   :  { %s1411_s15 = smov 0   ;;  %s1413_s16 = smov 0  }
   0xb LB: > { %1671 = sst [smem:[#allocation9_spill]] %s1334_s14  ;;  %s1662_s17 = sadd.s32 4294967295, %s1342_s16   ;;  %s1342_s16 = sphi %s1413_s16, %s26_s16   ;;  %s1338_s15 = sphi %s1411_s15, %s1689_s15   ;;  %s1334_s14 = sphi %s1409_s14, %s1688_s14   ;;  %s1330_s13 = sphi %s1407_s13, %s1687_s13   ;;  %s1326_s12 = sphi %s1405_s12, %s1686_s12   ;;  %s1322_s11 = sphi %s1403_s11, %s1692_s11   ;;  %s1318_s10 = sphi %s1401_s10, %s1691_s10   ;;  %s1314_s30 = sphi %s1399_s30, %s1690_s30  }
   0xc   : > { %1672 = sst [smem:[#allocation10_spill]] %s1338_s15  ;;  %s38_s18 = sadd.s32 1, %s1334_s14 }
   0xd   : > { %s45_s19 = sadd.s32 1, %s1338_s15  ;;  %p39_p0 = scmp.ge.s32.totalorder %s38_s18, 4 }
   0xe   : > { %s1024_s20 = sshll.u32 %s1338_s15, 2  ;;  %s1661_s21 = sadd.s32 4294967294, %s1342_s16  }
   0xf   : > { %s234_s22 = sadd.s32 %s1334_s14, %s1024_s20  ;;  %s1694_s18 = smov (%p39_p0, %s38_s18), 0 }
  0x10   : > { %1673 = sst [smem:[#allocation11_spill]] %s1694_s18  ;;  %s1696_s19 = smov (!%p39_p0, %s45_s19), %s1338_s15 }
  0x11   : > { %p252_p1 = scmp.ne.s32.totalorder %s1322_s11, %s1318_s10  ;;  %p253_p2 = scmp.eq.s32.totalorder %s1662_s17, 7 }
  0x12   : > { %p47_p3 = scmp.ge.s32.totalorder %s1696_s19, 2  ;;  %p258_p4 = scmp.ne.s32.totalorder %s1318_s10, %s1314_s30 }
  0x13   : > { %p1454_p5 = por %p253_p2, %p252_p1  ;;  %p259_p6 = scmp.eq.s32.totalorder %s1661_s21, 7 }
  0x14   : > { %s1698_s19 = smov (%p47_p3, %s1696_s19), 0  ;;  %p1032_p8 = scmp.ge.s32.totalorder %s1342_s16, 1 }
  0x15   : > { %1675 = sst [smem:[#allocation12_spill]] %s1698_s19  ;;  %p1462_p7 = por %p259_p6, %p258_p4 }
  0x16   : > { %s1025_s25 = sshll.u32 %s1698_s19, 2  ;;  %p393_p9 = scmp.lt.s32.totalorder %s1342_s16, 9 }
  0x17   : > { %s236_s26 = sadd.s32 %s1025_s25, %s1694_s18  ;;  %s242_s27 = sadd.s32 1, %s1322_s11 }
  0x18   : > { %s237_s28 = ssub.s32 %s234_s22, %s236_s26  ;;  %p394_p10 = pnand %p1032_p8, %p393_p9 }
  0x19   : > { %p240_p11 = scmp.eq.s32.totalorder %s237_s28, 0  ;;  %p472_p12 = scmp.lt.s32.totalorder (!%p394_p10), %s1326_s12, 3 }
  0x1a   : > { %397 = sbr.rel (%p394_p10) target bundleno = 298 (0x12a), region = 48  ;;  %p465_p13 = scmp.lt.s32.totalorder (!%p394_p10), %s1330_s13, 1 }
  0x1b   : > { %s1472_s29 = scalar_select %p240_p11, %s1322_s11, %s242_s27  }
  0x1c   : > { %s1678_s1 = sld [smem:[#allocation15_spill]] (!%p394_p10)  ;;  %s448_s14 = sand.u32 (!%p394_p10), 1, %s1318_s10  }
  0x1d   : > { %1677 = sst [smem:[#allocation13_spill]] %s1472_s29  ;;  %s1052_s15 = sshll.u32 (!%p394_p10), %s1330_s13, 2 }
  0x1e   : > { %s1679_s2 = sld [smem:[#allocation16_spill]] (!%p394_p10) }
  0x1f   : > { %v1344_v0 = vmov 0.0   ;;  %s1477_s20 = scalar_select %p472_p12, %s1326_s12, 3  ;;  %vm1345_vm0 = vmmov 0   ;;  %vm514_vm1 = vcmask 261120   ;;  %vm588_vm2 = vcmask 64512  }
  0x20   : > { %1078 = vmatprep.subr.mxu0 %v1344_v0  ;;  %1089 = vmatprep.subr.mxu1 %v1344_v0  ;;  %s466_s22 = scalar_select %p465_p13, %s1330_s13, 1 }
  0x21   : > { %1086 = vmatprep.mubr.msk.f32.mxu0 %vm1345_vm0, %v1344_v0  ;;  %1097 = vmatprep.mubr.msk.f32.mxu1 %vm1345_vm0, %v1344_v0  ;;  %s1060_s25 = sshll.u32 %s1477_s20, 5  ;;  %s1680_s0 = sld [smem:[#allocation14_spill]] }
  0x22   : > { %s476_s28 = scalar_lea.vmem %s1678_s1, %s1060_s25  ;;  %s1036_s18 = sshll.u32 %s466_s22, 3 }
  0x23   : > { %v506_v1 = vld [vmem:[%s476_s28 + $0x18] sm:$0xff]  ;;  %v505_v2 = vld [vmem:[%s476_s28 + $0x10] sm:$0xff]  ;;  %v504_v5 = vld [vmem:[%s476_s28 + $0x8] sm:$0xff]  ;;  %s486_s17 = scalar_lea.vmem %s1654_s3, %s1060_s25  ;;  %s773_s22 = sadd.s32 %s1326_s12, %s1052_s15 }
  0x24   : > { %s481_s19 = scalar_lea.vmem %s1679_s2, %s1060_s25  ;;  %1079 = vmatpush3.msra.mxu0 %v506_v1  ;;  %v503_v7 = vld [vmem:[%s476_s28] sm:$0xff]  ;;  %v675_v9 = vld [vmem:[%s486_s17 + $0x18] sm:$0xff]  ;;  %v674_v11 = vld [vmem:[%s486_s17 + $0x10] sm:$0xff]  ;;  %s492_s26 = scalar_lea.vmem %s1656_s5, %s1477_s20 }
  0x25   : > { %v593_v3 = vld [vmem:[%s481_s19 + $0x18] sm:$0xff]  ;;  %v592_v4 = vld [vmem:[%s481_s19 + $0x10] sm:$0xff]  ;;  %1080 = vmatprep.subr.mxu0 %v1344_v0  ;;  %v591_v6 = vld [vmem:[%s481_s19 + $0x8] sm:$0xff]  ;;  %s1512_s27 = sshll.u32 %s773_s22, 7  ;;  %s755_s15 = scalar_lea.sflag [#allocation3], %s448_s14 }
  0x26   : > { %1090 = vmatpush3.msra.mxu1 %v593_v3  ;;  %1081 = vmatpush3.msra.mxu0 %v505_v2  ;;  %v590_v10 = vld [vmem:[%s481_s19] sm:$0xff]  ;;  %v673_v12 = vld [vmem:[%s486_s17 + $0x8] sm:$0xff] }
  0x27   : > { %s471_s29 = scalar_lea.vmem %s1680_s0, %s1036_s18  ;;  %1091 = vmatprep.subr.mxu1 %v1344_v0  ;;  %1082 = vmatprep.subr.mxu0 %v1344_v0  ;;  %v672_v13 = vld [vmem:[%s486_s17] sm:$0xff]  ;;  %s1501_s18 = sshll.u32 %s448_s14, 3 }
  0x28   : > { %1092 = vmatpush3.msra.mxu1 %v592_v4  ;;  %1083 = vmatpush3.msra.mxu0 %v504_v5  ;;  %v502_v8 = vld [vmem:[%s471_s29] sm:$0xff]  ;;  %s489_s29 = scalar_lea.vmem %s1655_s4, %s1477_s20  ;;  %s450_s13 = scalar_lea.vmem [#allocation2], %s1501_s18 }
  0x29   : > { %1093 = vmatprep.subr.mxu1 %v1344_v0  ;;  %1084 = vmatprep.subr.mxu0 %v1344_v0  ;;  %v1043_v14 = vld [vmem:[%s489_s29] ss:$0 sm:$0xff]  ;;  %s781_s17 = sshll.u32 %s450_s13, 4  ;;  %s1681_s0 = sadd.s32 4294967295, %s1342_s16   ;;  %s1528_s17 = int_to_ptr.vmem [resolvable:$true] %s781_s17 }
  0x2a   : > { %1094 = vmatpush3.msra.mxu1 %v591_v6  ;;  %1085 = vmatpush3.msra.mxu0 %v503_v7  ;;  %s1517_s1 = sand.u32 1, %s1681_s0   ;;  %v1045_v16 = vld [vmem:[%s492_s26] ss:$0 sm:$0xff]  ;;  %s1667_s19 = scalar_lea.vmem [#allocation4], %s1501_s18 }
  0x2b   : > { %1095 = vmatprep.subr.mxu1 %v1344_v0  ;;  %1087 = vmatmul.mubr.msk.f32.vlgmr.msra.gmra.mxu0 %vm514_vm1, %v502_v8  ;;  %s797_s12 = sshll.u32 %s1667_s19, 4  ;;  %s1526_s29 = scalar_lea.hbm %s1658_s7, %s1512_s27  ;;  %s1540_s12 = int_to_ptr.vmem [resolvable:$true] %s797_s12 }
  0x2c   : > { %1100 = vmatprep.subr.mxu0 %v1344_v0  ;;  %1096 = vmatpush3.msra.mxu1 %v590_v10  ;;  %s1538_s19 = scalar_lea.hbm %s1659_s8, %s1512_s27  ;;  %s1194_s21 = scalar_lea.vmem %s1528_s17, 128 }
  0x2d   : > { %1101 = vmatpush3.msra.mxu0 %v675_v9  ;;  %1098 = vmatmul.mubr.msk.f32.vlgmr.msra.gmra.mxu1 %vm514_vm1, %v502_v8  ;;  %p1195_p0 = scmp.ne.s32.totalorder %s1528_s17, %s1194_s21  ;;  %s1346_s0 = smov [#allocation2]  }
  0x2e   : > { %1102 = vmatprep.subr.mxu0 %v1344_v0  ;;  %1108 = vmatprep.mubr.msk.f32.mxu0 %vm1345_vm0, %v1344_v0  ;;  %s1198_s22 = sshll.u32 %s1346_s0, 4  ;;  %s1199_s22 = int_to_ptr.vmem [resolvable:$false] %s1198_s22 }
  0x2f   : > { %1103 = vmatpush3.msra.mxu0 %v674_v11  ;;  %p1196_p1 = pnand %p1195_p0, %p1454_p5  ;;  %s1200_s25 = scalar_lea.vmem %s1199_s22, 256 }
  0x30   : > { %1104 = vmatprep.subr.mxu0 %v1344_v0  ;;  %p1201_p3 = scmp.lt.s32.totalorder %s1528_s17, %s1199_s22  ;;  %p1202_p4 = scmp.lt.s32.totalorder %s1200_s25, %s1194_s21 }
  0x31   : > { %1105 = vmatpush3.msra.mxu0 %v673_v12  ;;  %p1197_p2 = pneg %p1196_p1 }
  0x32   : > { %1106 = vmatprep.subr.mxu0 %v1344_v0  ;;  %p1203_p6 = por %p1202_p4, %p1201_p3 }
  0x33   : > { %1107 = vmatpush3.msra.mxu0 %v672_v13 }
  0x34   : > { %1109 = vmatmul.mubr.msk.f32.vlgmr.msra.gmra.mxu0 %vm514_vm1, %v502_v8  ;;  %p1204_p8 = pnand %p1203_p6, %p1197_p2 }
  0xeb   : > { %v584_v15 = vpop.f32.mrf.mxu0 }
  0xec   : > { %v585_v17 = vadd.f32 %v1043_v14, %v584_v15 }
  0xed   : > { %v1088_v18 = vpop.f32.mrf.mxu0  ;;  %v667_v19 = vpop.f32.mrf.mxu1 }
  0xee   : > { %v668_v20 = vadd.f32 %v1045_v16, %v667_v19  ;;  %589 = vst.msk [vmem:[%s450_s13] sm:$0xff] %vm588_vm2, %v585_v17 }
  0xef   : > { %v1099_v21 = vpop.f32.mrf.mxu1 }
  0xf0   : > { %1207 = shalt.err (!%p1204_p8)
}
  0xf1   : > { %s1208_s13 = scalar_lea.hbm %s1526_s29, 128  ;;  %s1212_s26 = scalar_lea.hbm %s1658_s7, 1024 }
  0xf2   : > { %p1209_p9 = scmp.ne.s32.totalorder %s1526_s29, %s1208_s13  ;;  %p1213_p12 = scmp.lt.s32.totalorder %s1526_s29, %s1658_s7 }
  0xf3   : > { %p1214_p13 = scmp.lt.s32.totalorder %s1212_s26, %s1208_s13 }
  0xf4   : > { %p1210_p10 = pnand %p1209_p9, %p1454_p5 }
  0xf5   : > { %p1215_p0 = por %p1214_p13, %p1213_p12 }
  0xf6   : > { %p1211_p11 = pneg %p1210_p10 }
  0xf8   : > { %p1216_p1 = pnand %p1215_p0, %p1211_p11 }
  0xfa   : > { %1219 = shalt.err (!%p1216_p1)
}
  0xfb   : > { %1111 = dma.vmem_to_hbm [thread:$0]  (%p1454_p5), %s1528_s17, 128, %s1526_s29, %s755_s15  }
  0xfc   : > { %s1682_s2 = scalar_lea.vmem [#allocation4], %s1501_s18  ;;  %s464_s25 = scalar_lea.vmem [#allocation6], %s1501_s18 }
  0xfd   : > { %671 = vst.msk [vmem:[%s1682_s2] sm:$0xff] %vm588_vm2, %v668_v20  ;;  %s1569_s21 = sshll.u32 %s464_s25, 4  ;;  %s1683_s14 = scalar_lea.vmem %s1657_s6, %s1477_s20  ;;  %s814_s21 = int_to_ptr.vmem [resolvable:$true] %s1569_s21 }
  0xfe   : > { %v1047_v22 = vld [vmem:[%s1683_s14] ss:$0 sm:$0xff]  ;;  %s760_s28 = scalar_lea.sflag [#allocation5], %s1517_s1  ;;  %s1220_s26 = scalar_lea.vmem %s1540_s12, 128 }
  0xff   : > { %p1221_p2 = scmp.ne.s32.totalorder %s1540_s12, %s1220_s26  ;;  %s1347_s0 = smov [#allocation4]  }
 0x100   : > { %s1224_s17 = sshll.u32 %s1347_s0, 4  ;;  %s1225_s17 = int_to_ptr.vmem [resolvable:$false] %s1224_s17 }
 0x101   : > { %p1222_p3 = pnand %p1221_p2, %p1454_p5  ;;  %s1226_s29 = scalar_lea.vmem %s1225_s17, 256 }
 0x102   : > { %p1227_p6 = scmp.lt.s32.totalorder %s1540_s12, %s1225_s17  ;;  %p1228_p8 = scmp.lt.s32.totalorder %s1226_s29, %s1220_s26 }
 0x103   : > { %p1223_p4 = pneg %p1222_p3 }
 0x104   : > { %p1229_p9 = por %p1228_p8, %p1227_p6 }
 0x106   : > { %p1230_p10 = pnand %p1229_p9, %p1223_p4 }
 0x108   : > { %1233 = shalt.err (!%p1230_p10)
}
 0x109   : > { %s1234_s20 = scalar_lea.hbm %s1538_s19, 128  ;;  %s1238_s22 = scalar_lea.hbm %s1659_s8, 1024 }
 0x10a   : > { %p1235_p11 = scmp.ne.s32.totalorder %s1538_s19, %s1234_s20  ;;  %p1239_p0 = scmp.lt.s32.totalorder %s1538_s19, %s1659_s8 }
 0x10b   : > { %p1240_p1 = scmp.lt.s32.totalorder %s1238_s22, %s1234_s20 }
 0x10c   : > { %p1236_p12 = pnand %p1235_p11, %p1454_p5 }
 0x10d   : > { %p1241_p2 = por %p1240_p1, %p1239_p0 }
 0x10e   : > { %p1237_p13 = pneg %p1236_p12 }
 0x110   : > { %p1242_p3 = pnand %p1241_p2, %p1237_p13 }
 0x112   : > { %1245 = shalt.err (!%p1242_p3)
}
 0x113   : > { %1112 = dma.vmem_to_hbm [thread:$0]  (%p1454_p5), %s1540_s12, 128, %s1538_s19, %s760_s28   ;;  %v749_v23 = vpop.f32.mrf.mxu0 }
 0x114   : > { %v750_v24 = vadd.f32 %v1047_v22, %v749_v23  ;;  %s811_s17 = scalar_lea.hbm %s1660_s9, %s1512_s27  ;;  %s1246_s29 = scalar_lea.vmem %s814_s21, 128 }
 0x115   : > { %v1110_v25 = vpop.f32.mrf.mxu0  ;;  %p1247_p4 = scmp.ne.s32.totalorder %s814_s21, %s1246_s29  ;;  %s1348_s20 = smov [#allocation6]  }
 0x116   : > { %753 = vst.msk [vmem:[%s464_s25] sm:$0xff] %vm588_vm2, %v750_v24  ;;  %s1250_s15 = sshll.u32 %s1348_s20, 4  ;;  %s1251_s15 = int_to_ptr.vmem [resolvable:$false] %s1250_s15 }
 0x117   : > { %p1248_p6 = pnand %p1247_p4, %p1454_p5  ;;  %s1252_s19 = scalar_lea.vmem %s1251_s15, 256 }
 0x118   : > { %p1253_p9 = scmp.lt.s32.totalorder %s814_s21, %s1251_s15  ;;  %p1254_p10 = scmp.lt.s32.totalorder %s1252_s19, %s1246_s29 }
 0x119   : > { %p1249_p8 = pneg %p1248_p6 }
 0x11a   : > { %p1255_p11 = por %p1254_p10, %p1253_p9 }
 0x11c   : > { %p1256_p12 = pnand %p1255_p11, %p1249_p8 }
 0x11e   : > { %1259 = shalt.err (!%p1256_p12)
}
 0x11f   : > { %s1260_s27 = scalar_lea.hbm %s811_s17, 128  ;;  %s1264_s25 = scalar_lea.hbm %s1660_s9, 1024 }
 0x120   : > { %p1261_p13 = scmp.ne.s32.totalorder %s811_s17, %s1260_s27  ;;  %p1265_p2 = scmp.lt.s32.totalorder %s811_s17, %s1660_s9 }
 0x121   : > { %p1266_p3 = scmp.lt.s32.totalorder %s1264_s25, %s1260_s27 }
 0x122   : > { %p1262_p0 = pnand %p1261_p13, %p1454_p5 }
 0x123   : > { %p1267_p4 = por %p1266_p3, %p1265_p2 }
 0x124   : > { %p1263_p1 = pneg %p1262_p0 }
 0x126   : > { %p1268_p6 = pnand %p1267_p4, %p1263_p1 }
 0x128   : > { %1271 = shalt.err (!%p1268_p6)
}
 0x129   : > { %1113 = dma.vmem_to_hbm [thread:$0]  (%p1454_p5), %s814_s21, 128, %s811_s17, %s760_s28  }
 0x12a PF: > { %p1127_p8 = scmp.ge.s32.totalorder %s1342_s16, 2  ;;  %s825_s13 = sand.u32 1, %s1314_s30  }
 0x12b   : > { %s826_s14 = scalar_lea.sflag [#allocation3], %s825_s13 }
 0x12c   : > { %p1118_p9 = pnand %p1127_p8, %p1462_p7 }
 0x12e   : > { %p1119_p10 = pneg %p1118_p9 }
 0x130   : > { %1305 = dma.done.wait (%p1119_p10), %s826_s14, 128  }
 0x131   : > { %1307 = vsyncadd (%p1119_p10), %s826_s14, 4294967168  ;;  %s1684_s26 = sadd.s32 4294967294, %s1342_s16  }
 0x132   : > { %s834_s0 = sand.u32 1, %s1684_s26  }
 0x133   : > { %s835_s29 = scalar_lea.sflag [#allocation5], %s834_s0 }
 0x134   : > { %1309 = dma.done.wait (%p1119_p10), %s835_s29, 256  }
 0x135   : > { %1311 = vsyncadd (%p1119_p10), %s835_s29, 4294967040  ;;  %s26_s16 = sadd.s32 1, %s1342_s16   ;;  %s1685_s1 = sld [smem:[#allocation13_spill]] }
 0x136   : > { %p23_p5 = scmp.ge.s32.totalorder %s26_s16, 10   ;;  %s1686_s12 = sld [smem:[#allocation9_spill]] }
 0x137   : > { %s1687_s13 = sld [smem:[#allocation10_spill]]  ;;  %s1690_s30 = smov %s1318_s10 }
 0x138   : > { %s1688_s14 = sld [smem:[#allocation11_spill]]  ;;  %s1691_s10 = smov %s1322_s11 }
 0x139   : > { %s1689_s15 = sld [smem:[#allocation12_spill]]  ;;  %25 = sbr.rel (!%p23_p5) target bundleno = 11 (0xb), region = 133 }
 0x13b   : > { %s1692_s11 = smov %s1685_s1 }
 0x13e   :  { %849 = vsyncpa [#allocation3], 1 }
 0x13f   :  { %851 = vsyncpa [#allocation3 + $0x1], 1 }
 0x140   :  { %852 = vsyncpa [#allocation5], 1 }
 0x141   :  { %854 = vsyncpa [#allocation5 + $0x1], 1 }

</bundles_post_ra>
